<compile_context>
chip_gen: v6e
topology: v6e:2x2x1
jax: 0.10.0
libtpu: 0.0.40
codegen_flags: <defaults>
</compile_context>

<pallas_src>
import functools
import numpy as np
import jax
import jax.numpy as jnp
from jax.experimental import pallas as pl
from jax.experimental.pallas import tpu as pltpu

STATE_DIM = 150
ACTION_DIM = 1
HID1 = 256
HID2 = 128
B_MAX = 8000000.0
B_MIN = 10000.0
_LOG_BMIN = float(np.log(B_MIN))
_LOG_BMAX = float(np.log(B_MAX))
_LOG_RANGE = float(_LOG_BMAX - _LOG_BMIN)
_INV_LOG_RANGE = float(1.0 / _LOG_RANGE)

MUL_WEIGHTS = np.array([
    9.108388780987298e-07, 1.059008923220972e-06, 1.0491108923815773e-06, 1.1062785461035674e-06,
    1.1233828445256222e-06, 1.2176325299151358e-06, 1.2276935876798234e-06, 1.225727373821428e-06,
    1.2282000625418732e-06, 1.2310398460613214e-06, 0.11547315120697021, 0.1370280683040619,
    0.13245660066604614, 0.14291255176067352, 0.14601102471351624, 0.01579149439930916,
    0.015916554257273674, 0.015866877511143684, 0.015860475599765778, 0.01589406281709671,
    0.00012113105913158506, 0.00014051565085537732, 0.00013927537656854838, 0.00014692841796204448,
    0.0001496588665759191, 1.6243957361439243e-05, 1.6617701476207003e-05, 1.658736618992407e-05,
    1.6620524547761306e-05, 1.669244738877751e-05, 0.007275158539414406, 0.009120622649788857,
    0.008939903229475021, 0.009114483371376991, 0.008997362107038498, 0.007180711720138788,
    0.00841580517590046, 0.007690922822803259, 0.008248683996498585, 0.008288963697850704,
    0.00620803888887167, 0.007471443619579077, 0.007342279423028231, 0.0074492571875452995,
    0.007365750148892403, 0.006154336035251617, 0.006908596493303776, 0.006505969446152449,
    0.006853444501757622, 0.006897413171827793, 0.008673721924424171, 0.008673866279423237,
    0.008672562427818775, 0.008672185242176056, 0.008671551011502743, 0.008673721924424171,
    0.008665213361382484, 0.00865672342479229, 0.008649756200611591, 0.008646947331726551,
    1.799630045890808, 2.278015613555908, 2.185457706451416, 2.502725124359131,
    2.1366732120513916, 0.7276115417480469, 0.7529850602149963, 0.7551690936088562,
    0.7569636106491089, 0.7683706283569336, 0.04213936626911163, 0.07190877199172974,
    0.06961502134799957, 0.07673759758472443, 0.07813231647014618, 0.021535275503993034,
    0.026588434353470802, 0.025132175534963608, 0.02553657442331314, 0.026560090482234955,
    0.036353643983602524, 0.04710008576512337, 0.048716530203819275, 0.04568418487906456,
    0.048586416989564896, 0.042830608785152435, 0.052614402025938034, 0.047247227281332016,
    0.0500192828476429, 0.049893688410520554, 0.06829073280096054, 0.12170270830392838,
    0.1143275797367096, 0.12081389874219894, 0.11699365079402924, 0.057100776582956314,
    0.07574842870235443, 0.0641368180513382, 0.07225460559129715, 0.07336115837097168,
    8.385283470153809, 8.79195785522461, 8.734068870544434, 8.727130889892578,
    8.733592987060547, 9.911806106567383, 10.059857368469238, 9.928916931152344,
    9.957329750061035, 9.947797775268555, 0.5528498291969299, 0.6015455722808838,
    0.6040346622467041, 0.6128904819488525, 0.6106728315353394, 0.45432814955711365,
    0.4981219172477722, 0.47951459884643555, 0.4930354356765747, 0.47873011231422424,
    3.129629373550415, 2.868824005126953, 2.8642611503601074, 2.9201724529266357,
    2.926238536834717, 3.7120745182037354, 3.6531338691711426, 3.61527681350708,
    3.5694897174835205, 3.5351955890655518, 3.234508514404297, 2.8877975940704346,
    2.9905972480773926, 2.9318313598632812, 2.9699902534484863, 3.759488582611084,
    3.7236077785491943, 3.7136762142181396, 3.6999588012695312, 3.696364641189575,
    20.4775333404541, 19.821626663208008, 20.3739013671875, 19.948535919189453,
    20.258892059326172, 34.844886779785156, 34.0961799621582, 33.8519172668457,
    33.95980453491211, 34.118324279785156], dtype=np.float32)

SUB_WEIGHTS = np.array([
    738496.125, 694683.3125, 691479.25, 673617.375, 666556.0625, 681600.1875, 669463.3125,
    666129.0, 662238.1875, 659593.75, 7.3224053382873535, 6.640115737915039, 6.661839008331299,
    6.499343395233154, 6.463366985321045, 66.41350555419922, 65.2419204711914, 65.0151138305664,
    64.62989807128906, 64.40997314453125, 5549.7080078125, 5218.357421875, 5197.064453125,
    5061.17431640625, 5007.40673828125, 51043.18359375, 50241.6328125, 50011.48046875,
    49687.8984375, 49473.1640625, 51.766231536865234, 43.154056549072266, 46.73100662231445,
    44.35700988769531, 45.82548522949219, 54.172786712646484, 52.25625228881836, 52.80331802368164,
    52.15654754638672, 51.818397521972656, -8.076197624206543, -9.032713890075684,
    -8.184115409851074, -8.881279945373535, -8.57718276977539, -6.027364253997803,
    -7.842897415161133, -7.138024806976318, -7.600769519805908, -7.766489505767822,
    151.33204650878906, 151.2038116455078, 151.07054138183594, 150.9722900390625,
    150.88592529296875, 151.33204650878906, 150.38157653808594, 149.42373657226562,
    148.60403442382812, 147.83462524414062, 1.048581838607788, 0.9403055310249329,
    0.965387225151062, 0.9410541653633118, 0.9549955725669861, 1.2477848529815674,
    1.222879409790039, 1.2160511016845703, 1.2063682079315186, 1.194684624671936,
    12.129443168640137, 9.123194694519043, 9.858774185180664, 9.137080192565918,
    9.637124061584473, 28.483427047729492, 27.244096755981445, 27.210426330566406,
    27.071775436401367, 26.76516342163086, 20.601516723632812, 17.87394142150879,
    18.152664184570312, 18.502660751342773, 17.923423767089844, 18.974851608276367,
    18.55058479309082, 18.663055419921875, 18.46375274658203, 18.452112197875977,
    8.178370475769043, 5.5424723625183105, 6.423187732696533, 5.719115734100342,
    6.158593654632568, 12.5791015625, 11.946151733398438, 12.197224617004395,
    11.995094299316406, 12.022625923156738, 0.03417285904288292, 0.029939087107777596,
    0.0304565466940403, 0.030316563323140144, 0.030231211334466934, 0.04919557273387909,
    0.0460132472217083, 0.04782531410455704, 0.04682319611310959, 0.04794519394636154,
    0.31053441762924194, 0.27375665307044983, 0.27528613805770874, 0.271941214799881,
    0.26977038383483887, 0.8403489589691162, 0.7605294585227966, 0.8009557127952576,
    0.771939218044281, 0.8093596696853638, 0.5885034799575806, 0.5472908020019531,
    0.561969518661499, 0.555245578289032, 0.5488224029541016, 0.5749943256378174,
    0.5683791637420654, 0.5661110281944275, 0.5616078972816467, 0.5590522885322571,
    0.42020806670188904, 0.41124776005744934, 0.40748050808906555, 0.40527647733688354,
    0.414554625749588, 0.43730807304382324, 0.43566998839378357, 0.4336211681365967,
    0.4324624836444855, 0.43000659346580505, 0.004606906324625015, 0.004368430934846401,
    0.004239862319082022, 0.00433636549860239, 0.004258331842720509, 0.005296767223626375,
    0.005273005925118923, 0.005282784346491098, 0.00526299886405468, 0.005225192755460739],
    dtype=np.float32)


def _detect_fuse_l2():
    """Block-diagonal layer-2 fusion only pays off on 256-wide MXUs (v6e/v7x)."""
    try:
        kind = jax.devices()[0].device_kind.lower()
    except Exception:
        return True
    return not any(v in kind for v in ("v2", "v3", "v4", "v5"))


_FUSE_L2 = _detect_fuse_l2()


# ----------------------------- kernels -------------------------------------

def _critic_kernel_fused(state_ref, action_ref, sub_ref,
                         w1_ref, wac_ref, b1_ref,
                         w25_ref, b25_ref, w36_ref, b36_ref,
                         q_ref):
    # Centering stays f32 (cancellation on ~7e5-magnitude features); `mul` is
    # folded into w1 rows host-side (scale-invariant under bf16 rounding).
    s = (state_ref[...] - sub_ref[...]).astype(jnp.bfloat16)            # (TB, 150)
    # Action: log + shift + clamp; the remaining affine ((a-0.5)*2 and the
    # 1/log-range scale) is folded into wac / b1 host-side.
    a = jnp.clip(jnp.log(action_ref[...]) - _LOG_BMIN,
                 -_LOG_RANGE, _LOG_RANGE)                                # (TB, 1)

    # Layer 1 of BOTH heads: one bf16 MXU matmul (concat eliminated; the
    # action enters as a rank-1 VPU correction on a non-MXU VLIW slot).
    h = jnp.dot(s, w1_ref[...], preferred_element_type=jnp.float32)      # (TB, 512)
    h = jnp.maximum(h + a * wac_ref[...] + b1_ref[...], 0.0).astype(jnp.bfloat16)

    # Layer 2 of both heads: ONE block-diagonal (512, 256) bf16 matmul that
    # fills the 256-wide MXU on v6e/v7x.
    g = jnp.dot(h, w25_ref[...], preferred_element_type=jnp.float32)     # (TB, 256)
    g = jnp.maximum(g + b25_ref[...], 0.0).astype(jnp.bfloat16)

    # Output layers of both heads: ONE bf16 (256, 2) matmul, single store.
    q_ref[...] = (jnp.dot(g, w36_ref[...], preferred_element_type=jnp.float32)
                  + b36_ref[...])


def _critic_kernel_split(state_ref, action_ref, sub_ref,
                         w1_ref, wac_ref, b1_ref,
                         w2_ref, b2_ref, w5_ref, b5_ref,
                         w3_ref, w6_ref, b36_ref,
                         q_ref):
    s = (state_ref[...] - sub_ref[...]).astype(jnp.bfloat16)            # (TB, 150)
    a = jnp.clip(jnp.log(action_ref[...]) - _LOG_BMIN,
                 -_LOG_RANGE, _LOG_RANGE)                                # (TB, 1)

    h = jnp.dot(s, w1_ref[...], preferred_element_type=jnp.float32)      # (TB, 512)
    h = jnp.maximum(h + a * wac_ref[...] + b1_ref[...], 0.0).astype(jnp.bfloat16)

    # Per-head layer 2: N=128 already fills v5e's 128x128 MXU -> keep split.
    h1 = jnp.maximum(
        jnp.dot(h[:, :HID1], w2_ref[...], preferred_element_type=jnp.float32)
        + b2_ref[...], 0.0).astype(jnp.bfloat16)                          # (TB, 128)
    h2 = jnp.maximum(
        jnp.dot(h[:, HID1:], w5_ref[...], preferred_element_type=jnp.float32)
        + b5_ref[...], 0.0).astype(jnp.bfloat16)                          # (TB, 128)

    # Output layer: two bf16 N=2 matmuls (same push count as a fused K=256
    # matmul on a 128-deep MXU) summed, single (TB, 2) store.
    q_ref[...] = (jnp.dot(h1, w3_ref[...], preferred_element_type=jnp.float32)
                  + jnp.dot(h2, w6_ref[...], preferred_element_type=jnp.float32)
                  + b36_ref[...])


# --------------------------- host-side helpers ------------------------------

def make_params(key):
    """Deterministic PyTorch-Linear-style init, stored as (in, out) matrices."""
    dims = [(STATE_DIM + ACTION_DIM, HID1), (HID1, HID2), (HID2, 1),
            (STATE_DIM + ACTION_DIM, HID1), (HID1, HID2), (HID2, 1)]
    params = {}
    for idx, (fan_in, fan_out) in enumerate(dims, start=1):
        key, kw, kb = jax.random.split(key, 3)
        bound = 1.0 / np.sqrt(fan_in)
        params[f"w{idx}"] = jax.random.uniform(kw, (fan_in, fan_out), jnp.float32, -bound, bound)
        params[f"b{idx}"] = jax.random.uniform(kb, (1, fan_out), jnp.float32, -bound, bound)
    params["sub"] = jnp.asarray(SUB_WEIGHTS).reshape(1, -1)
    params["mul"] = jnp.asarray(MUL_WEIGHTS).reshape(1, -1)
    return params


def _round_up(x, m):
    return ((x + m - 1) // m) * m


def _prep_weights(params, fuse_l2):
    """Fuse heads / fold normalization into the MXU weights (wrapper-side XLA)."""
    w1, w4 = params["w1"], params["w4"]
    mul_col = params["mul"].reshape(STATE_DIM, 1)                         # (150, 1)
    # layer-1 state rows of both heads, with `mul` folded in (bf16 MXU operand)
    w1c = (mul_col * jnp.concatenate([w1[:STATE_DIM], w4[:STATE_DIM]], axis=1)
           ).astype(jnp.bfloat16)                                         # (150, 512)
    wa = jnp.concatenate([w1[STATE_DIM:], w4[STATE_DIM:]], axis=1)        # (1, 512) f32
    # fold  a_final = 2*(log(a)-logbmin)/range - 1  into wac / b1
    wac = (2.0 * _INV_LOG_RANGE) * wa
    b1c = jnp.concatenate([params["b1"], params["b4"]], axis=1) - wa      # (1, 512) f32
    b36 = jnp.concatenate([params["b3"], params["b6"]], axis=1)           # (1, 2)   f32
    zcol = jnp.zeros((HID2, 1), jnp.float32)

    if fuse_l2:
        w25 = jnp.zeros((2 * HID1, 2 * HID2), jnp.float32)
        w25 = w25.at[:HID1, :HID2].set(params["w2"]).at[HID1:, HID2:].set(params["w5"])
        w25 = w25.astype(jnp.bfloat16)                                    # (512, 256)
        b25 = jnp.concatenate([params["b2"], params["b5"]], axis=1)       # (1, 256)
        w36 = jnp.concatenate(
            [jnp.concatenate([params["w3"], zcol], axis=1),
             jnp.concatenate([zcol, params["w6"]], axis=1)],
            axis=0).astype(jnp.bfloat16)                                  # (256, 2)
        return (w1c, wac, b1c, w25, b25, w36, b36)
    else:
        w2 = params["w2"].astype(jnp.bfloat16)                            # (256, 128)
        w5 = params["w5"].astype(jnp.bfloat16)                            # (256, 128)
        w3b = jnp.concatenate([params["w3"], zcol], axis=1).astype(jnp.bfloat16)  # (128, 2)
        w6b = jnp.concatenate([zcol, params["w6"]], axis=1).astype(jnp.bfloat16)  # (128, 2)
        return (w1c, wac, b1c, w2, params["b2"], w5, params["b5"], w3b, w6b, b36)


def _const_spec(shape):
    return pl.BlockSpec(shape, lambda i: (0, 0))    # VMEM-resident across steps


@functools.partial(jax.jit, static_argnames=("fuse_l2",))
def _critic_forward_impl(state, action, params, fuse_l2):
    B = state.shape[0]
    state = state.astype(jnp.float32)
    action2d = action.reshape(B, 1).astype(jnp.float32)

    # Batch tile: <=2048 (amortize ~0.35us/step overhead), multiple of 8, with
    # >=2 grid steps when possible (both v7x TCs get work, and the next state
    # tile's DMA overlaps compute), chosen so batch padding stays tiny.
    n_steps = 1 if B <= 8 else max(2, pl.cdiv(B, 2048))
    tb = min(2048, max(8, _round_up(pl.cdiv(B, n_steps), 8)))
    n_steps = pl.cdiv(B, tb)
    b_pad = n_steps * tb
    if b_pad != B:
        state = jnp.pad(state, ((0, b_pad - B), (0, 0)))
        # pad actions with 1.0 so jnp.log of the dummy rows stays finite
        action2d = jnp.pad(action2d, ((0, b_pad - B), (0, 0)), constant_values=1.0)

    weights = _prep_weights(params, fuse_l2)
    kernel = _critic_kernel_fused if fuse_l2 else _critic_kernel_split

    in_specs = [
        pl.BlockSpec((tb, STATE_DIM), lambda i: (i, 0)),   # state (streamed)
        pl.BlockSpec((tb, 1), lambda i: (i, 0)),           # action (streamed)
        _const_spec((1, STATE_DIM)),                        # sub
    ] + [_const_spec(w.shape) for w in weights]
    out_specs = pl.BlockSpec((tb, 2), lambda i: (i, 0))

    if fuse_l2:
        mac = STATE_DIM * 2 * HID1 + (2 * HID1) * (2 * HID2) + (2 * HID2) * 2
    else:
        mac = STATE_DIM * 2 * HID1 + 2 * HID1 * HID2 + 2 * HID2 * 2
    weight_bytes = sum(int(np.prod(w.shape)) * w.dtype.itemsize for w in weights)
    cost = pl.CostEstimate(
        flops=2 * b_pad * mac + 6 * b_pad * STATE_DIM,
        transcendentals=b_pad,
        bytes_accessed=b_pad * (STATE_DIM * 4 + 4 + 8) + weight_bytes + STATE_DIM * 4)

    q = pl.pallas_call(
        kernel,
        out_shape=jax.ShapeDtypeStruct((b_pad, 2), jnp.float32),
        grid_spec=pltpu.PrefetchScalarGridSpec(
            num_scalar_prefetch=0,
            grid=(n_steps,),
            in_specs=in_specs,
            out_specs=out_specs),
        compiler_params=pltpu.CompilerParams(
            dimension_semantics=("parallel",),              # megacore sharding on v7x
            vmem_limit_bytes=40 * 1024 * 1024),
        cost_estimate=cost,
    )(state, action2d, params["sub"], *weights)

    return q[:B, 0:1], q[:B, 1:2]


def critic_forward(state, action, params):
    """Twin-Q forward. Returns (q1, q2), each (B, 1) float32."""
    return _critic_forward_impl(state, action, params, _FUSE_L2)


def critic_forward_ref(state, action, params):
    """Pure-JAX f32 reference mirroring the PyTorch forward."""
    s = (state - params["sub"]) * params["mul"]
    a = (jnp.log(action) - jnp.log(B_MIN)) / (jnp.log(B_MAX) - jnp.log(B_MIN))
    a = jnp.clip(a, -1.0, 1.0)
    a = ((a - 0.5) * 2.0)[:, None]
    sa = jnp.concatenate([s, a], axis=-1)
    q1 = jax.nn.relu(sa @ params["w1"] + params["b1"])
    q1 = jax.nn.relu(q1 @ params["w2"] + params["b2"])
    q1 = q1 @ params["w3"] + params["b3"]
    q2 = jax.nn.relu(sa @ params["w4"] + params["b4"])
    q2 = jax.nn.relu(q2 @ params["w5"] + params["b5"])
    q2 = q2 @ params["w6"] + params["b6"]
    return q1, q2


if __name__ == "__main__":
    key = jax.random.PRNGKey(0)
    k_params, k_state, k_action = jax.random.split(key, 3)
    params = make_params(k_params)

    B = 64
    # state roughly on the scale implied by sub_weights; exact scale irrelevant
    state = (jax.random.normal(k_state, (B, STATE_DIM), jnp.float32)
             * jnp.asarray(SUB_WEIGHTS) * 0.1 + jnp.asarray(SUB_WEIGHTS))
    # action is a bid-like positive scalar per example (log-normalized inside)
    action = jax.random.uniform(k_action, (B,), jnp.float32, 2e4, 5e6)

    q1, q2 = critic_forward(state, action, params)
    jax.block_until_ready((q1, q2))

    r1, r2 = critic_forward_ref(state, action, params)
    # bf16 MXU operands (f32 accumulate) -> loosened tolerance vs the f32 reference
    np.testing.assert_allclose(np.asarray(q1), np.asarray(r1), rtol=3e-2, atol=3e-2)
    np.testing.assert_allclose(np.asarray(q2), np.asarray(r2), rtol=3e-2, atol=3e-2)

    print("KERNEL_OK")
</pallas_src>

<mosaic_0001>
module attributes {stable_mosaic.version = 11 : i64} {
  func.func @_critic_kernel_fused(%arg0: i32, %arg1: memref<32x150xf32, #tpu.memory_space<vmem>>, %arg2: memref<32x1xf32, #tpu.memory_space<vmem>>, %arg3: memref<1x150xf32, #tpu.memory_space<vmem>>, %arg4: memref<150x512xbf16, #tpu.memory_space<vmem>>, %arg5: memref<1x512xf32, #tpu.memory_space<vmem>>, %arg6: memref<1x512xf32, #tpu.memory_space<vmem>>, %arg7: memref<512x256xbf16, #tpu.memory_space<vmem>>, %arg8: memref<1x256xf32, #tpu.memory_space<vmem>>, %arg9: memref<256x2xbf16, #tpu.memory_space<vmem>>, %arg10: memref<1x2xf32, #tpu.memory_space<vmem>>, %arg11: memref<32x2xf32, #tpu.memory_space<vmem>>) attributes {dimension_semantics = [#tpu.dimension_semantics<parallel>], iteration_bounds = array<i64: 2>, scalar_prefetch = 0 : i64, scratch_operands = 0 : i64, tpu.core_type = #tpu.core_type<tc>, window_params = [{transform_indices = @transform_0, window_bounds = array<i64: 32, 150>}, {transform_indices = @transform_1, window_bounds = array<i64: 32, 1>}, {pipeline_mode = #tpu.pipeline_mode<synchronous>, transform_indices = @transform_2, window_bounds = array<i64: 1, 150>}, {pipeline_mode = #tpu.pipeline_mode<synchronous>, transform_indices = @transform_3, window_bounds = array<i64: 150, 512>}, {pipeline_mode = #tpu.pipeline_mode<synchronous>, transform_indices = @transform_4, window_bounds = array<i64: 1, 512>}, {pipeline_mode = #tpu.pipeline_mode<synchronous>, transform_indices = @transform_5, window_bounds = array<i64: 1, 512>}, {pipeline_mode = #tpu.pipeline_mode<synchronous>, transform_indices = @transform_6, window_bounds = array<i64: 512, 256>}, {pipeline_mode = #tpu.pipeline_mode<synchronous>, transform_indices = @transform_7, window_bounds = array<i64: 1, 256>}, {pipeline_mode = #tpu.pipeline_mode<synchronous>, transform_indices = @transform_8, window_bounds = array<i64: 256, 2>}, {pipeline_mode = #tpu.pipeline_mode<synchronous>, transform_indices = @transform_9, window_bounds = array<i64: 1, 2>}, {transform_indices = @transform_10, window_bounds = array<i64: 32, 2>}]} {
    %c0 = arith.constant 0 : index
    %c0_0 = arith.constant 0 : index
    %0 = vector.load %arg1[%c0, %c0_0] : memref<32x150xf32, #tpu.memory_space<vmem>>, vector<32x150xf32>
    %c0_1 = arith.constant 0 : index
    %c0_2 = arith.constant 0 : index
    %1 = vector.load %arg3[%c0_1, %c0_2] : memref<1x150xf32, #tpu.memory_space<vmem>>, vector<1x150xf32>
    %2 = vector.broadcast %1 : vector<1x150xf32> to vector<32x150xf32>
    %3 = arith.subf %0, %2 : vector<32x150xf32>
    %4 = arith.truncf %3 : vector<32x150xf32> to vector<32x150xbf16>
    %c0_3 = arith.constant 0 : index
    %c0_4 = arith.constant 0 : index
    %5 = vector.load %arg2[%c0_3, %c0_4] : memref<32x1xf32, #tpu.memory_space<vmem>>, vector<32x1xf32>
    %6 = math.log %5 : vector<32x1xf32>
    %cst = arith.constant 9.21034049 : f32
    %7 = vector.broadcast %cst : f32 to vector<32x1xf32>
    %8 = arith.subf %6, %7 : vector<32x1xf32>
    %cst_5 = arith.constant -6.6846118 : f32
    %cst_6 = arith.constant 6.6846118 : f32
    %9 = vector.broadcast %cst_5 : f32 to vector<32x1xf32>
    %10 = arith.maximumf %9, %8 : vector<32x1xf32>
    %11 = vector.broadcast %cst_6 : f32 to vector<32x1xf32>
    %12 = arith.minimumf %11, %10 : vector<32x1xf32>
    %c0_7 = arith.constant 0 : index
    %c0_8 = arith.constant 0 : index
    %13 = vector.load %arg4[%c0_7, %c0_8] : memref<150x512xbf16, #tpu.memory_space<vmem>>, vector<150x512xbf16>
    %cst_9 = arith.constant dense<0.000000e+00> : vector<32x512xf32>
    %14 = tpu.matmul %4, %13, %cst_9 {dimension_numbers = #tpu.dot_dimension_numbers<[1], [0], [0], [1], [0, 0, 1, 1], [], []>} : vector<32x150xbf16>, vector<150x512xbf16>, vector<32x512xf32> -> vector<32x512xf32>
    %c0_10 = arith.constant 0 : index
    %c0_11 = arith.constant 0 : index
    %15 = vector.load %arg5[%c0_10, %c0_11] : memref<1x512xf32, #tpu.memory_space<vmem>>, vector<1x512xf32>
    %16 = vector.broadcast %12 : vector<32x1xf32> to vector<32x512xf32>
    %17 = vector.broadcast %15 : vector<1x512xf32> to vector<32x512xf32>
    %18 = arith.mulf %16, %17 : vector<32x512xf32>
    %19 = arith.addf %14, %18 : vector<32x512xf32>
    %c0_12 = arith.constant 0 : index
    %c0_13 = arith.constant 0 : index
    %20 = vector.load %arg6[%c0_12, %c0_13] : memref<1x512xf32, #tpu.memory_space<vmem>>, vector<1x512xf32>
    %21 = vector.broadcast %20 : vector<1x512xf32> to vector<32x512xf32>
    %22 = arith.addf %19, %21 : vector<32x512xf32>
    %cst_14 = arith.constant 0.000000e+00 : f32
    %23 = vector.broadcast %cst_14 : f32 to vector<32x512xf32>
    %24 = arith.maximumf %22, %23 : vector<32x512xf32>
    %25 = arith.truncf %24 : vector<32x512xf32> to vector<32x512xbf16>
    %c0_15 = arith.constant 0 : index
    %c0_16 = arith.constant 0 : index
    %26 = vector.load %arg7[%c0_15, %c0_16] : memref<512x256xbf16, #tpu.memory_space<vmem>>, vector<512x256xbf16>
    %cst_17 = arith.constant dense<0.000000e+00> : vector<32x256xf32>
    %27 = tpu.matmul %25, %26, %cst_17 {dimension_numbers = #tpu.dot_dimension_numbers<[1], [0], [0], [1], [0, 0, 1, 1], [], []>} : vector<32x512xbf16>, vector<512x256xbf16>, vector<32x256xf32> -> vector<32x256xf32>
    %c0_18 = arith.constant 0 : index
    %c0_19 = arith.constant 0 : index
    %28 = vector.load %arg8[%c0_18, %c0_19] : memref<1x256xf32, #tpu.memory_space<vmem>>, vector<1x256xf32>
    %29 = vector.broadcast %28 : vector<1x256xf32> to vector<32x256xf32>
    %30 = arith.addf %27, %29 : vector<32x256xf32>
    %cst_20 = arith.constant 0.000000e+00 : f32
    %31 = vector.broadcast %cst_20 : f32 to vector<32x256xf32>
    %32 = arith.maximumf %30, %31 : vector<32x256xf32>
    %33 = arith.truncf %32 : vector<32x256xf32> to vector<32x256xbf16>
    %c0_21 = arith.constant 0 : index
    %c0_22 = arith.constant 0 : index
    %34 = vector.load %arg9[%c0_21, %c0_22] : memref<256x2xbf16, #tpu.memory_space<vmem>>, vector<256x2xbf16>
    %cst_23 = arith.constant dense<0.000000e+00> : vector<32x2xf32>
    %35 = tpu.matmul %33, %34, %cst_23 {dimension_numbers = #tpu.dot_dimension_numbers<[1], [0], [0], [1], [0, 0, 1, 1], [], []>} : vector<32x256xbf16>, vector<256x2xbf16>, vector<32x2xf32> -> vector<32x2xf32>
    %c0_24 = arith.constant 0 : index
    %c0_25 = arith.constant 0 : index
    %36 = vector.load %arg10[%c0_24, %c0_25] : memref<1x2xf32, #tpu.memory_space<vmem>>, vector<1x2xf32>
    %37 = vector.broadcast %36 : vector<1x2xf32> to vector<32x2xf32>
    %38 = arith.addf %35, %37 : vector<32x2xf32>
    %c0_26 = arith.constant 0 : index
    %c0_27 = arith.constant 0 : index
    %39 = vector.load %arg11[%c0_26, %c0_27] : memref<32x2xf32, #tpu.memory_space<vmem>>, vector<32x2xf32>
    tpu.vector_store %arg11[%c0_26, %c0_27], %38 {strides = array<i32>} : memref<32x2xf32, #tpu.memory_space<vmem>>, vector<32x2xf32>,
    return
  }
  func.func @transform_0(%arg0: i32) -> (i32, i32) {
    %c0_i32 = arith.constant 0 : i32
    %c0_i32_0 = arith.constant 0 : i32
    return %arg0, %c0_i32 : i32, i32
  }
  func.func @transform_1(%arg0: i32) -> (i32, i32) {
    %c0_i32 = arith.constant 0 : i32
    %c0_i32_0 = arith.constant 0 : i32
    return %arg0, %c0_i32 : i32, i32
  }
  func.func @transform_2(%arg0: i32) -> (i32, i32) {
    %c0_i32 = arith.constant 0 : i32
    %c0_i32_0 = arith.constant 0 : i32
    %c0_i32_1 = arith.constant 0 : i32
    return %c0_i32, %c0_i32_0 : i32, i32
  }
  func.func @transform_3(%arg0: i32) -> (i32, i32) {
    %c0_i32 = arith.constant 0 : i32
    %c0_i32_0 = arith.constant 0 : i32
    %c0_i32_1 = arith.constant 0 : i32
    return %c0_i32, %c0_i32_0 : i32, i32
  }
  func.func @transform_4(%arg0: i32) -> (i32, i32) {
    %c0_i32 = arith.constant 0 : i32
    %c0_i32_0 = arith.constant 0 : i32
    %c0_i32_1 = arith.constant 0 : i32
    return %c0_i32, %c0_i32_0 : i32, i32
  }
  func.func @transform_5(%arg0: i32) -> (i32, i32) {
    %c0_i32 = arith.constant 0 : i32
    %c0_i32_0 = arith.constant 0 : i32
    %c0_i32_1 = arith.constant 0 : i32
    return %c0_i32, %c0_i32_0 : i32, i32
  }
  func.func @transform_6(%arg0: i32) -> (i32, i32) {
    %c0_i32 = arith.constant 0 : i32
    %c0_i32_0 = arith.constant 0 : i32
    %c0_i32_1 = arith.constant 0 : i32
    return %c0_i32, %c0_i32_0 : i32, i32
  }
  func.func @transform_7(%arg0: i32) -> (i32, i32) {
    %c0_i32 = arith.constant 0 : i32
    %c0_i32_0 = arith.constant 0 : i32
    %c0_i32_1 = arith.constant 0 : i32
    return %c0_i32, %c0_i32_0 : i32, i32
  }
  func.func @transform_8(%arg0: i32) -> (i32, i32) {
    %c0_i32 = arith.constant 0 : i32
    %c0_i32_0 = arith.constant 0 : i32
    %c0_i32_1 = arith.constant 0 : i32
    return %c0_i32, %c0_i32_0 : i32, i32
  }
  func.func @transform_9(%arg0: i32) -> (i32, i32) {
    %c0_i32 = arith.constant 0 : i32
    %c0_i32_0 = arith.constant 0 : i32
    %c0_i32_1 = arith.constant 0 : i32
    return %c0_i32, %c0_i32_0 : i32, i32
  }
  func.func @transform_10(%arg0: i32) -> (i32, i32) {
    %c0_i32 = arith.constant 0 : i32
    %c0_i32_0 = arith.constant 0 : i32
    return %arg0, %c0_i32 : i32, i32
  }
}

</mosaic_0001>

<bundles_post_ra>
// kernel: _critic_forward_impl.1
= control target key start
LH: loop header
LB: loop body
LE: loop exit
PB: predicated region body
PF: predicated region fallthrough
CT: control target
= control target key end

     0   :  { %s2137_s13 = smov 0   ;;  %s2604_s0 = inlined_call_operand.vmem [shape: f32[64,150], index: 0, kind: input, shape index: {}]   ;;  %s2605_s1 = inlined_call_operand.vmem [shape: f32[64,1], index: 1, kind: input, shape index: {}]   ;;  %s2606_s2 = inlined_call_operand.vmem [shape: f32[1,150], index: 2, kind: input, shape index: {}]   ;;  %s2607_s3 = inlined_call_operand.vmem [shape: bf16[150,512], index: 3, kind: input, shape index: {}]   ;;  %s2608_s4 = inlined_call_operand.vmem [shape: f32[1,512], index: 4, kind: input, shape index: {}]   ;;  %s2609_s5 = inlined_call_operand.vmem [shape: f32[1,512], index: 5, kind: input, shape index: {}]   ;;  %s2610_s6 = inlined_call_operand.vmem [shape: bf16[512,256], index: 6, kind: input, shape index: {}]   ;;  %s2611_s7 = inlined_call_operand.vmem [shape: f32[1,256], index: 7, kind: input, shape index: {}]   ;;  %s2612_s8 = inlined_call_operand.vmem [shape: bf16[256,2], index: 8, kind: input, shape index: {}]   ;;  %s2613_s9 = inlined_call_operand.vmem [shape: f32[1,2], index: 9, kind: input, shape index: {}]   ;;  %s2614_s10 = inlined_call_operand.vmem [shape: f32[64,2], index: 10, kind: output, shape index: {}]  }
   0x1 LB: > { %s1690_s14 = sadd.s32 4294967295, %s2079_s13   ;;  %p1694_p0 = scmp.ge.s32.totalorder %s2079_s13, 1  ;;  %s2079_s13 = sphi %s2137_s13, %s20_s13  }
   0x2   : > { %p325_p1 = scmp.lt.s32.totalorder %s2079_s13, 3 }
   0x4   : > { %p326_p2 = pnand %p1694_p0, %p325_p1 }
   0x5   : > { %s1695_s23 = sshll.u32 (!%p326_p2), %s1690_s14, 2 }
   0x6   : > { %329 = sbr.rel (%p326_p2) target bundleno = 681 (0x2a9), region = 60  ;;  %p370_p3 = scmp.lt.s32.totalorder (!%p326_p2), %s1695_s23, 7 }
   0xb   : > { %v1895_v0 = vld [vmem:[%s2607_s3 + $0xe4] ss:$16 sps:$4 sm:$0xff]   ;;  %v1897_v1 = vld [vmem:[%s2607_s3 + $0xec] ss:$16 sps:$4 sm:$0xff]   ;;  %v1899_v2 = vld [vmem:[%s2607_s3 + $0xe0] ss:$16 sps:$4 sm:$0xff]   ;;  %v399_v19 = vlaneseq }
   0xc   : > { %751 = vmatprep.subr.bf16.mxu0 %v1895_v0  ;;  %v1900_v3 = vld [vmem:[%s2607_s3 + $0xe8] ss:$16 sps:$4 sm:$0xff]   ;;  %804 = vmatprep.subr.bf16.mxu1 %v1897_v1  ;;  %v1901_v4 = vld [vmem:[%s2607_s3 + $0xc4] ss:$16 sps:$4 sm:$0xff]   ;;  %v1903_v5 = vld [vmem:[%s2607_s3 + $0xcc] ss:$16 sps:$4 sm:$0xff]  }
   0xd   : > { %752 = vmatpush1.bf16.msra.mxu0 %v1899_v2  ;;  %805 = vmatpush1.bf16.msra.mxu1 %v1900_v3  ;;  %v1905_v6 = vld [vmem:[%s2607_s3 + $0xc0] ss:$16 sps:$4 sm:$0xff]   ;;  %v1906_v7 = vld [vmem:[%s2607_s3 + $0xc8] ss:$16 sps:$4 sm:$0xff]   ;;  %v2081_v8 = vmov 0   ;;  %s2616_s23 = smov (!%p370_p3, %s1695_s23), 7 }
   0xe   : > { %753 = vmatprep.subr.bf16.mxu0 %v1901_v4  ;;  %1893 = vset.pattern.permute.xlu0 %v2081_v8  ;;  %v1907_v9 = vld [vmem:[%s2607_s3 + $0xa4] ss:$16 sps:$4 sm:$0xff]   ;;  %v1909_v10 = vld [vmem:[%s2607_s3 + $0xac] ss:$16 sps:$4 sm:$0xff]   ;;  %v1911_v11 = vld [vmem:[%s2607_s3 + $0xa0] ss:$16 sps:$4 sm:$0xff]  }
   0xf   : > { %806 = vmatprep.subr.bf16.mxu1 %v1903_v5  ;;  %1894 = vset.pattern.permute.xlu1 %v2081_v8  ;;  %v1912_v12 = vld [vmem:[%s2607_s3 + $0xa8] ss:$16 sps:$4 sm:$0xff]   ;;  %v1913_v13 = vld [vmem:[%s2607_s3 + $0x84] ss:$16 sps:$4 sm:$0xff]   ;;  %v1915_v14 = vld [vmem:[%s2607_s3 + $0x8c] ss:$16 sps:$4 sm:$0xff]  }
  0x10   : > { %v1917_v15 = vld [vmem:[%s2607_s3 + $0x80] ss:$16 sps:$4 sm:$0xff]   ;;  %v1918_v16 = vld [vmem:[%s2607_s3 + $0x88] ss:$16 sps:$4 sm:$0xff]   ;;  %v1919_v17 = vld [vmem:[%s2607_s3 + $0x64] ss:$16 sps:$4 sm:$0xff]  }
  0x11   : > { %754 = vmatpush1.bf16.msra.mxu0 %v1905_v6  ;;  %807 = vmatpush1.bf16.msra.mxu1 %v1906_v7  ;;  %v1921_v18 = vld [vmem:[%s2607_s3 + $0x6c] ss:$16 sps:$4 sm:$0xff]   ;;  %v1923_v20 = vld [vmem:[%s2607_s3 + $0x60] ss:$16 sps:$4 sm:$0xff]   ;;  %v1924_v21 = vld [vmem:[%s2607_s3 + $0x68] ss:$16 sps:$4 sm:$0xff]  }
  0x12   : > { %755 = vmatprep.subr.bf16.mxu0 %v1907_v9  ;;  %808 = vmatprep.subr.bf16.mxu1 %v1909_v10  ;;  %v1925_v22 = vld [vmem:[%s2607_s3 + $0x44] ss:$16 sps:$4 sm:$0xff]   ;;  %v1927_v23 = vld [vmem:[%s2607_s3 + $0x4c] ss:$16 sps:$4 sm:$0xff]   ;;  %v2213_v24 = vshrl.u32 %v399_v19, 7  ;;  %s1839_s24 = sshll.u32 %s2616_s23, 4 }
  0x13   : > { %v1929_v25 = vld [vmem:[%s2607_s3 + $0x40] ss:$16 sps:$4 sm:$0xff]   ;;  %v1930_v26 = vld [vmem:[%s2607_s3 + $0x48] ss:$16 sps:$4 sm:$0xff]   ;;  %v1931_v27 = vld [vmem:[%s2607_s3 + $0x24] ss:$16 sps:$4 sm:$0xff]   ;;  %s2234_s18 = scalar_lea.vmem %s2604_s0, %s1839_s24 }
  0x14   : > { %v1933_v28 = vld [vmem:[%s2607_s3 + $0x2c] ss:$16 sps:$4 sm:$0xff]   ;;  %v1935_v29 = vld [vmem:[%s2607_s3 + $0x20] ss:$16 sps:$4 sm:$0xff]   ;;  %v2237_v30 = vsub.s32 1, %v2213_v24  ;;  %s1699_s19 = sshll.u32 %s2616_s23, 3 }
  0x15   : > { %756 = vmatpush1.bf16.msra.mxu0 %v1911_v11  ;;  %809 = vmatpush1.bf16.msra.mxu1 %v1912_v12  ;;  %v1936_v31 = vld [vmem:[%s2607_s3 + $0x28] ss:$16 sps:$4 sm:$0xff]   ;;  %v1937_v32 = vld [vmem:[%s2607_s3 + $0x4] ss:$16 sps:$4 sm:$0xff]   ;;  %v1939_v33 = vld [vmem:[%s2607_s3 + $0xc] ss:$16 sps:$4 sm:$0xff]   ;;  %s380_s12 = scalar_lea.vmem %s2605_s1, %s1699_s19  ;;  %s386_s14 = scalar_lea.vmem %s2614_s10, %s1699_s19 }
  0x16   : > { %757 = vmatprep.subr.bf16.mxu0 %v1913_v13  ;;  %810 = vmatprep.subr.bf16.mxu1 %v1915_v14  ;;  %v481_v34 = vld [vmem:[%s2607_s3 + $0x120] sm:$0x77]  ;;  %v390_v35 = vld [vmem:[%s2234_s18 + $0x8] sm:$0xff]  ;;  %v392_v36 = vld [vmem:[%s2234_s18 + $0x18] sm:$0xff]  ;;  %v2273_v42 = vsub.s32 0, %v2213_v24  ;;  %vm738_vm0 = vcmask 1042432  }
  0x17   : > { %v397_v37 = vld [vmem:[%s2606_s2] sm:$0x3]  ;;  %v482_v38 = vld [vmem:[%s2607_s3 + $0x128] sm:$0x77]  ;;  %v1747_v43 = vcombine.high %v481_v34, %v481_v34  ;;  %v423_v48 = vld [vmem:[%s380_s12 + $0x10] sm:$0xff]  ;;  %v1746_v50 = vcombine.low %v481_v34, %v481_v34  ;;  %vm731_vm1 = vcmask 179200  }
  0x18   : > { %v406_v39 = vrot.slane %v397_v37, %v2237_v30  ;;  %v1941_v40 = vld [vmem:[%s2607_s3] ss:$16 sps:$4 sm:$0xff]   ;;  %v1942_v41 = vld [vmem:[%s2607_s3 + $0x8] ss:$16 sps:$4 sm:$0xff]   ;;  %v1749_v49 = vcombine.high %v482_v38, %v482_v38  ;;  %v1748_v51 = vcombine.low %v482_v38, %v482_v38  ;;  %v1947_v54 = vld [vmem:[%s2607_s3 + $0x104] ss:$16 sps:$4 sm:$0xff]   ;;  %v2282_v56 = vrot.slane %v397_v37, %v2273_v42 }
  0x19   : > { %758 = vmatpush1.bf16.msra.mxu0 %v1917_v15  ;;  %811 = vmatpush1.bf16.msra.mxu1 %v1918_v16  ;;  %v421_v46 = vld [vmem:[%s380_s12] sm:$0xff]  ;;  %v422_v47 = vld [vmem:[%s380_s12 + $0x8] sm:$0xff]  ;;  %v424_v52 = vld [vmem:[%s380_s12 + $0x18] sm:$0xff]  ;;  %v740_v60 = vsel %vm738_vm0, %v1746_v50, 0  ;;  %vm1617_vm2 = vcmask 15360  }
  0x1a   : > { %759 = vmatprep.subr.bf16.mxu0 %v1919_v17  ;;  %812 = vmatprep.subr.bf16.mxu1 %v1921_v18  ;;  %v410_v44 = vsub.f32 %v390_v35, %v406_v39  ;;  %v412_v45 = vsub.f32 %v392_v36, %v406_v39  ;;  %2065 = vlog2.f32 %v421_v46  ;;  %v1949_v55 = vld [vmem:[%s2607_s3 + $0x10c] ss:$16 sps:$4 sm:$0xff]   ;;  %v389_v57 = vld [vmem:[%s2234_s18] sm:$0xff]  ;;  %v391_v58 = vld [vmem:[%s2234_s18 + $0x10] sm:$0xff]  ;;  %v746_v61 = vsel %vm738_vm0, %v1748_v51, 0 }
  0x1b   : > { %2067 = vlog2.f32 %v422_v47  ;;  %v394_v59 = vld [vmem:[%s2234_s18 + $0x28] sm:$0xff]  ;;  %v396_v62 = vld [vmem:[%s2234_s18 + $0x38] sm:$0xff]  ;;  %v1951_v63 = vld [vmem:[%s2607_s3 + $0x100] ss:$16 sps:$4 sm:$0xff]   ;;  %v409_v1 = vsub.f32 %v389_v57, %v2282_v56  ;;  %v411_v2 = vsub.f32 %v391_v58, %v2282_v56 }
  0x1c   : > { %v418_v53 = vpack.c.bf16 %v412_v45, %v410_v44  ;;  %2069 = vlog2.f32 %v423_v48  ;;  %v1952_v0 = vld [vmem:[%s2607_s3 + $0x108] ss:$16 sps:$4 sm:$0xff]   ;;  %v414_v3 = vsub.f32 %v394_v59, %v406_v39  ;;  %v416_v4 = vsub.f32 %v396_v62, %v406_v39  ;;  %v1955_v5 = vld [vmem:[%s2610_s6 + $0x74] ss:$8 sps:$4 sm:$0xff]   ;;  %v393_v8 = vld [vmem:[%s2234_s18 + $0x20] sm:$0xff] }
  0x1d   : > { %760 = vmatpush1.bf16.msra.mxu0 %v1923_v20  ;;  %813 = vmatpush1.bf16.msra.mxu1 %v1924_v21  ;;  %2071 = vlog2.f32 %v424_v52  ;;  %v1958_v6 = vld [vmem:[%s2610_s6 + $0x174] ss:$8 sps:$4 sm:$0xff]   ;;  %v417_v7 = vpack.c.bf16 %v411_v2, %v409_v1  ;;  %v1953_v11 = vld [vmem:[%s2610_s6 + $0x70] ss:$8 sps:$4 sm:$0xff]   ;;  %v1961_v14 = vld [vmem:[%s2610_s6 + $0x64] ss:$8 sps:$4 sm:$0xff]   ;;  %v413_v17 = vsub.f32 %v393_v8, %v2282_v56 }
  0x1e   : > { %761 = vmatprep.subr.bf16.mxu0 %v1925_v22  ;;  %814 = vmatprep.subr.bf16.mxu1 %v1927_v23  ;;  %v395_v9 = vld [vmem:[%s2234_s18 + $0x30] sm:$0xff]  ;;  %v420_v10 = vpack.c.bf16 %v416_v4, %v414_v3  ;;  %v1964_v15 = vld [vmem:[%s2610_s6 + $0x164] ss:$8 sps:$4 sm:$0xff]   ;;  %v1959_v22 = vld [vmem:[%s2610_s6 + $0x60] ss:$8 sps:$4 sm:$0xff]  }
  0x1f   : > { %1751 = vmatprep.mubr.msk.bf16.mxu0 %vm731_vm1, %v418_v53  ;;  %1754 = vmatprep.mubr.msk.bf16.mxu1 %vm731_vm1, %v418_v53  ;;  %v1956_v12 = vld [vmem:[%s2610_s6 + $0x170] ss:$8 sps:$4 sm:$0xff]   ;;  %v415_v18 = vsub.f32 %v395_v9, %v2282_v56  ;;  %v1970_v37 = vld [vmem:[%s2610_s6 + $0x154] ss:$8 sps:$4 sm:$0xff]   ;;  %v1971_v45 = vld [vmem:[%s2610_s6 + $0x40] ss:$8 sps:$4 sm:$0xff]  }
  0x20   : > { %v1965_v36 = vld [vmem:[%s2610_s6 + $0x50] ss:$8 sps:$4 sm:$0xff]   ;;  %v1974_v46 = vld [vmem:[%s2610_s6 + $0x140] ss:$8 sps:$4 sm:$0xff]   ;;  %v1979_v47 = vld [vmem:[%s2610_s6 + $0x34] ss:$8 sps:$4 sm:$0xff]  }
  0x21   : > { %762 = vmatpush1.bf16.msra.mxu0 %v1929_v25  ;;  %815 = vmatpush1.bf16.msra.mxu1 %v1930_v26  ;;  %v1982_v48 = vld [vmem:[%s2610_s6 + $0x134] ss:$8 sps:$4 sm:$0xff]   ;;  %v1980_v50 = vld [vmem:[%s2610_s6 + $0x130] ss:$8 sps:$4 sm:$0xff]   ;;  %v1985_v51 = vld [vmem:[%s2610_s6 + $0x24] ss:$8 sps:$4 sm:$0xff]  }
  0x22   : > { %763 = vmatprep.subr.bf16.mxu0 %v1931_v27  ;;  %816 = vmatprep.subr.bf16.mxu1 %v1933_v28  ;;  %v1962_v27 = vld [vmem:[%s2610_s6 + $0x160] ss:$8 sps:$4 sm:$0xff]   ;;  %v1988_v52 = vld [vmem:[%s2610_s6 + $0x124] ss:$8 sps:$4 sm:$0xff]   ;;  %v1989_v56 = vld [vmem:[%s2610_s6 + $0x10] ss:$8 sps:$4 sm:$0xff]  }
  0x23   : > { %v1983_v53 = vld [vmem:[%s2610_s6 + $0x20] ss:$8 sps:$4 sm:$0xff]   ;;  %v1994_v57 = vld [vmem:[%s2610_s6 + $0x114] ss:$8 sps:$4 sm:$0xff]   ;;  %v1992_v58 = vld [vmem:[%s2610_s6 + $0x110] ss:$8 sps:$4 sm:$0xff]  }
  0x24   : > { %v1997_v59 = vld [vmem:[%s2610_s6 + $0x4] ss:$8 sps:$4 sm:$0xff]   ;;  %v1998_v62 = vld [vmem:[%s2610_s6 + $0x100] ss:$8 sps:$4 sm:$0xff]   ;;  %v2001_v1 = vld [vmem:[%s2610_s6 + $0xf0] ss:$8 sps:$4 sm:$0xff]  }
  0x25   : > { %764 = vmatpush1.bf16.msra.mxu0 %v1935_v29  ;;  %817 = vmatpush1.bf16.msra.mxu1 %v1936_v31  ;;  %v1967_v31 = vld [vmem:[%s2610_s6 + $0x54] ss:$8 sps:$4 sm:$0xff]   ;;  %v2004_v2 = vld [vmem:[%s2610_s6 + $0x1f0] ss:$8 sps:$4 sm:$0xff]   ;;  %v2009_v3 = vld [vmem:[%s2610_s6 + $0xe4] ss:$8 sps:$4 sm:$0xff]  }
  0x26   : > { %765 = vmatprep.subr.bf16.mxu0 %v1937_v32  ;;  %818 = vmatprep.subr.bf16.mxu1 %v1939_v33  ;;  %v419_v32 = vpack.c.bf16 %v415_v18, %v413_v17  ;;  %v2012_v4 = vld [vmem:[%s2610_s6 + $0x1e4] ss:$8 sps:$4 sm:$0xff]   ;;  %v2018_v8 = vld [vmem:[%s2610_s6 + $0x1d4] ss:$8 sps:$4 sm:$0xff]   ;;  %v2013_v9 = vld [vmem:[%s2610_s6 + $0xd0] ss:$8 sps:$4 sm:$0xff]  }
  0x27   : > { %v2066_v13 = vpop.eup %2065  ;;  %v2025_v17 = vld [vmem:[%s2610_s6 + $0xb0] ss:$8 sps:$4 sm:$0xff]  }
  0x28   : > { %v2068_v16 = vpop.eup %2067  ;;  %v426_v19 = vmul.f32 0.6931472, %v2066_v13  ;;  %v2019_v13 = vld [vmem:[%s2610_s6 + $0xc0] ss:$8 sps:$4 sm:$0xff]   ;;  %v2028_v18 = vld [vmem:[%s2610_s6 + $0x1b0] ss:$8 sps:$4 sm:$0xff]  }
  0x29   : > { %766 = vmatpush1.bf16.msra.mxu0 %v1941_v40  ;;  %819 = vmatpush1.bf16.msra.mxu1 %v1942_v41  ;;  %v2070_v20 = vpop.eup %2069  ;;  %v428_v21 = vmul.f32 0.6931472, %v2068_v16  ;;  %v1968_v40 = vld [vmem:[%s2610_s6 + $0x150] ss:$8 sps:$4 sm:$0xff]   ;;  %v1973_v41 = vld [vmem:[%s2610_s6 + $0x44] ss:$8 sps:$4 sm:$0xff]  }
  0x2a   : > { %1750 = vmatprep.subr.msk.bf16.mxu0 %vm738_vm0, %v1747_v43  ;;  %1753 = vmatprep.subr.msk.bf16.mxu1 %vm738_vm0, %v1749_v49  ;;  %v2072_v23 = vpop.eup %2071  ;;  %v1702_v25 = vadd.f32 -9.2103405, %v426_v19  ;;  %v430_v26 = vmul.f32 0.6931472, %v2070_v20  ;;  %v1976_v43 = vld [vmem:[%s2610_s6 + $0x144] ss:$8 sps:$4 sm:$0xff]  }
  0x2b   : > { %v1703_v28 = vadd.f32 -9.2103405, %v428_v21  ;;  %v432_v29 = vmul.f32 0.6931472, %v2072_v23  ;;  %v1977_v49 = vld [vmem:[%s2610_s6 + $0x30] ss:$8 sps:$4 sm:$0xff]  }
  0x2c   : > { %v1706_v33 = vclamps-f32 %v1702_v25, 6.684612  ;;  %v1704_v34 = vadd.f32 -9.2103405, %v430_v26  ;;  %v2030_v16 = vld [vmem:[%s2610_s6 + $0x1b4] ss:$8 sps:$4 sm:$0xff]  }
  0x2d   : > { %780 = vmatpush2.bf16.msra.mxu0 %v740_v60  ;;  %833 = vmatpush2.bf16.msra.mxu1 %v746_v61  ;;  %v1705_v35 = vadd.f32 -9.2103405, %v432_v29  ;;  %v1707_v38 = vclamps-f32 %v1703_v28, 6.684612  ;;  %v2000_v60 = vld [vmem:[%s2610_s6 + $0x104] ss:$8 sps:$4 sm:$0xff]  }
  0x2e   : > { %781 = vmatprep.subr.bf16.mxu0 %v1947_v54  ;;  %834 = vmatprep.subr.bf16.mxu1 %v1949_v55  ;;  %v1708_v39 = vclamps-f32 %v1704_v34, 6.684612  ;;  %v1986_v54 = vld [vmem:[%s2610_s6 + $0x120] ss:$8 sps:$4 sm:$0xff]   ;;  %v1991_v55 = vld [vmem:[%s2610_s6 + $0x14] ss:$8 sps:$4 sm:$0xff]  }
  0x2f   : > { %486 = vperm.xlu0 %1893, %v1706_v33   ;;  %v1709_v44 = vclamps-f32 %v1705_v35, 6.684612  ;;  %v1995_v61 = vld [vmem:[%s2610_s6] ss:$8 sps:$4 sm:$0xff]   ;;  %v2033_v19 = vld [vmem:[%s2610_s6 + $0xa4] ss:$8 sps:$4 sm:$0xff]  }
  0x30   : > { %496 = vperm.xlu1 %1894, %v1708_v39   ;;  %v2036_v20 = vld [vmem:[%s2610_s6 + $0x1a4] ss:$8 sps:$4 sm:$0xff]   ;;  %v2031_v21 = vld [vmem:[%s2610_s6 + $0xa0] ss:$8 sps:$4 sm:$0xff]   ;;  %v2039_v23 = vld [vmem:[%s2610_s6 + $0x94] ss:$8 sps:$4 sm:$0xff]  }
  0x31   : > { %782 = vmatpush2.bf16.msra.mxu0 %v1951_v63  ;;  %835 = vmatpush2.bf16.msra.mxu1 %v1952_v0  ;;  %v2003_v63 = vld [vmem:[%s2610_s6 + $0xf4] ss:$8 sps:$4 sm:$0xff]   ;;  %v2037_v26 = vld [vmem:[%s2610_s6 + $0x90] ss:$8 sps:$4 sm:$0xff]   ;;  %v2045_v28 = vld [vmem:[%s2610_s6 + $0x84] ss:$8 sps:$4 sm:$0xff]  }
  0x32   : > { %1315 = vmatprep.subr.bf16.mxu0 %v1955_v5  ;;  %1368 = vmatprep.subr.bf16.mxu1 %v1958_v6  ;;  %v2006_v0 = vld [vmem:[%s2610_s6 + $0x1f4] ss:$8 sps:$4 sm:$0xff]   ;;  %v2007_v5 = vld [vmem:[%s2610_s6 + $0xe0] ss:$8 sps:$4 sm:$0xff]   ;;  %v2048_v29 = vld [vmem:[%s2610_s6 + $0x184] ss:$8 sps:$4 sm:$0xff]  }
  0x33   : > { %491 = vperm.xlu0 %1893, %v1707_v38   ;;  %v2010_v6 = vld [vmem:[%s2610_s6 + $0x1e0] ss:$8 sps:$4 sm:$0xff]   ;;  %v2042_v25 = vld [vmem:[%s2610_s6 + $0x194] ss:$8 sps:$4 sm:$0xff]   ;;  %v515_v34 = vsub.s32 2, %v2213_v24 }
  0x34   : > { %784 = vmatmul.mubr.bf16.vlgmr.msra.gmra.mxu0 %v417_v7  ;;  %837 = vmatmul.mubr.bf16.vlgmr.msra.gmra.mxu1 %v417_v7  ;;  %v2015_v7 = vld [vmem:[%s2610_s6 + $0xd4] ss:$8 sps:$4 sm:$0xff]   ;;  %v483_v35 = vld [vmem:[%s2608_s4] sm:$0xf] }
  0x35   : > { %1752 = vmatprep.mubr.msk.bf16.mxu0 %vm731_vm1, %v420_v10  ;;  %1755 = vmatprep.mubr.msk.bf16.mxu1 %vm731_vm1, %v420_v10  ;;  %v2016_v10 = vld [vmem:[%s2610_s6 + $0x1d0] ss:$8 sps:$4 sm:$0xff]   ;;  %v516_v38 = vrot.slane %v483_v35, %v515_v34 }
  0x36   : > { %1316 = vmatpush1.bf16.msra.mxu0 %v1953_v11  ;;  %1369 = vmatpush1.bf16.msra.mxu1 %v1956_v12  ;;  %v2021_v11 = vld [vmem:[%s2610_s6 + $0xc4] ss:$8 sps:$4 sm:$0xff]   ;;  %v2049_v33 = vld [vmem:[%s2612_s8 + $0x78] sm:$0xff]  }
  0x37   : > { %1317 = vmatprep.subr.bf16.mxu0 %v1961_v14  ;;  %1370 = vmatprep.subr.bf16.mxu1 %v1964_v15  ;;  %v2024_v12 = vld [vmem:[%s2610_s6 + $0x1c4] ss:$8 sps:$4 sm:$0xff]   ;;  %v2022_v14 = vld [vmem:[%s2610_s6 + $0x1c0] ss:$8 sps:$4 sm:$0xff]   ;;  %v2027_v15 = vld [vmem:[%s2610_s6 + $0xb4] ss:$8 sps:$4 sm:$0xff]  }
  0x38   : > { %501 = vperm.xlu1 %1894, %v1709_v44  }
  0x3a   : > { %1318 = vmatpush1.bf16.msra.mxu0 %v1959_v22  ;;  %1371 = vmatpush1.bf16.msra.mxu1 %v1962_v27  ;;  %v2034_v22 = vld [vmem:[%s2610_s6 + $0x1a0] ss:$8 sps:$4 sm:$0xff]   ;;  %v2040_v27 = vld [vmem:[%s2610_s6 + $0x190] ss:$8 sps:$4 sm:$0xff]  }
  0x3b   : > { %1319 = vmatprep.subr.bf16.mxu0 %v1967_v31  ;;  %1372 = vmatprep.subr.bf16.mxu1 %v1970_v37  ;;  %v2043_v31 = vld [vmem:[%s2610_s6 + $0x80] ss:$8 sps:$4 sm:$0xff]   ;;  %v508_v37 = vrot.slane %v483_v35, %v2273_v42 }
  0x3c   : > { %794 = vmatmul.mubr.bf16.gmra.mxu0 %v419_v32  ;;  %847 = vmatmul.mubr.bf16.gmra.mxu1 %v419_v32  ;;  %v2046_v32 = vld [vmem:[%s2610_s6 + $0x180] ss:$8 sps:$4 sm:$0xff]  }
  0x3e   : > { %1320 = vmatpush1.bf16.msra.mxu0 %v1965_v36  ;;  %1373 = vmatpush1.bf16.msra.mxu1 %v1968_v40  ;;  %v519_v36 = vsub.s32 3, %v2213_v24  ;;  %v512_v40 = vrot.slane %v483_v35, %v2237_v30 }
  0x3f   : > { %1321 = vmatprep.subr.bf16.mxu0 %v1973_v41  ;;  %1374 = vmatprep.subr.bf16.mxu1 %v1976_v43 }
  0x40   : > { %v520_v41 = vrot.slane %v483_v35, %v519_v36 }
  0x42   : > { %1322 = vmatpush1.bf16.msra.mxu0 %v1971_v45  ;;  %1375 = vmatpush1.bf16.msra.mxu1 %v1974_v46  ;;  %v857_v45 = vld [vmem:[%s2609_s5] sm:$0xf] }
  0x43   : > { %1323 = vmatprep.subr.bf16.mxu0 %v1979_v47  ;;  %1376 = vmatprep.subr.bf16.mxu1 %v1982_v48 }
  0x46   : > { %1324 = vmatpush1.bf16.msra.mxu0 %v1977_v49  ;;  %1377 = vmatpush1.bf16.msra.mxu1 %v1980_v50 }
  0x47   : > { %1325 = vmatprep.subr.bf16.mxu0 %v1985_v51  ;;  %1378 = vmatprep.subr.bf16.mxu1 %v1988_v52  ;;  %v2514_v52 = vrot.slane %v857_v45, %v2273_v42 }
  0x4a   : > { %1326 = vmatpush1.bf16.msra.mxu0 %v1983_v53  ;;  %1379 = vmatpush1.bf16.msra.mxu1 %v1986_v54  ;;  %v2516_v54 = vrot.slane %v857_v45, %v515_v34 }
  0x4b   : > { %1327 = vmatprep.subr.bf16.mxu0 %v1991_v55  ;;  %1380 = vmatprep.subr.bf16.mxu1 %v1994_v57 }
  0x4e   : > { %1328 = vmatpush1.bf16.msra.mxu0 %v1989_v56  ;;  %1381 = vmatpush1.bf16.msra.mxu1 %v1992_v58  ;;  %v2519_v58 = vrot.slane %v857_v45, %v2237_v30 }
  0x4f   : > { %1329 = vmatprep.subr.bf16.mxu0 %v1997_v59  ;;  %1382 = vmatprep.subr.bf16.mxu1 %v2000_v60  ;;  %v2521_v60 = vrot.slane %v857_v45, %v519_v36 }
  0x52   : > { %1330 = vmatpush1.bf16.msra.mxu0 %v1995_v61  ;;  %1383 = vmatpush1.bf16.msra.mxu1 %v1998_v62 }
  0x53   : > { %1331 = vmatprep.subr.bf16.mxu0 %v2003_v63  ;;  %1384 = vmatprep.subr.bf16.mxu1 %v2006_v0 }
  0x56   : > { %1332 = vmatpush2.bf16.msra.mxu0 %v2001_v1  ;;  %1385 = vmatpush2.bf16.msra.mxu1 %v2004_v2 }
  0x57   : > { %1333 = vmatprep.subr.bf16.mxu0 %v2009_v3  ;;  %1386 = vmatprep.subr.bf16.mxu1 %v2012_v4 }
  0x5a   : > { %1334 = vmatpush2.bf16.msra.mxu0 %v2007_v5  ;;  %1387 = vmatpush2.bf16.msra.mxu1 %v2010_v6 }
  0x5b   : > { %1335 = vmatprep.subr.bf16.mxu0 %v2015_v7  ;;  %1388 = vmatprep.subr.bf16.mxu1 %v2018_v8 }
  0x5e   : > { %1336 = vmatpush2.bf16.msra.mxu0 %v2013_v9  ;;  %1389 = vmatpush2.bf16.msra.mxu1 %v2016_v10 }
  0x5f   : > { %1337 = vmatprep.subr.bf16.mxu0 %v2021_v11  ;;  %1390 = vmatprep.subr.bf16.mxu1 %v2024_v12 }
  0x62   : > { %1338 = vmatpush2.bf16.msra.mxu0 %v2019_v13  ;;  %1391 = vmatpush2.bf16.msra.mxu1 %v2022_v14 }
  0x63   : > { %1339 = vmatprep.subr.bf16.mxu0 %v2027_v15  ;;  %1392 = vmatprep.subr.bf16.mxu1 %v2030_v16 }
  0x66   : > { %1340 = vmatpush2.bf16.msra.mxu0 %v2025_v17  ;;  %1393 = vmatpush2.bf16.msra.mxu1 %v2028_v18 }
  0x67   : > { %1341 = vmatprep.subr.bf16.mxu0 %v2033_v19  ;;  %1394 = vmatprep.subr.bf16.mxu1 %v2036_v20 }
  0x6a   : > { %1342 = vmatpush2.bf16.msra.mxu0 %v2031_v21  ;;  %1395 = vmatpush2.bf16.msra.mxu1 %v2034_v22 }
  0x6b   : > { %1343 = vmatprep.subr.bf16.mxu0 %v2039_v23  ;;  %1396 = vmatprep.subr.bf16.mxu1 %v2042_v25 }
  0x6e   : > { %1344 = vmatpush2.bf16.msra.mxu0 %v2037_v26  ;;  %1397 = vmatpush2.bf16.msra.mxu1 %v2040_v27 }
  0x6f   : > { %1345 = vmatprep.subr.bf16.mxu0 %v2045_v28  ;;  %1398 = vmatprep.subr.bf16.mxu1 %v2048_v29 }
  0x72   : > { %1346 = vmatpush2.bf16.msra.mxu0 %v2043_v31  ;;  %1399 = vmatpush2.bf16.msra.mxu1 %v2046_v32 }
  0x73   : > { %1840 = vmatprep.subr.bf16.mxu0 %v2049_v33  ;;  %1868 = vmatprep.subr.bf16.mxu1 %v2049_v33 }
  0xaa   : > { %v487_v39 = vpop.permute.xlu0 %486 }
  0xab   : > { %v525_v43 = vmul.f32 %v508_v37, %v487_v39  ;;  %v527_v44 = vmul.f32 %v516_v38, %v487_v39  ;;  %v526_v46 = vmul.f32 %v512_v40, %v487_v39  ;;  %v528_v47 = vmul.f32 %v520_v41, %v487_v39  ;;  %v497_v48 = vpop.permute.xlu1 %496 }
  0xac   : > { %v533_v1 = vmul.f32 %v508_v37, %v497_v48  ;;  %v535_v2 = vmul.f32 %v516_v38, %v497_v48  ;;  %v534_v6 = vmul.f32 %v512_v40, %v497_v48  ;;  %v536_v7 = vmul.f32 %v520_v41, %v497_v48 }
  0xae   : > { %v492_v51 = vpop.permute.xlu0 %491 }
  0xaf   : > { %v529_v61 = vmul.f32 %v508_v37, %v492_v51  ;;  %v531_v63 = vmul.f32 %v516_v38, %v492_v51  ;;  %v530_v3 = vmul.f32 %v512_v40, %v492_v51  ;;  %v532_v4 = vmul.f32 %v520_v41, %v492_v51 }
  0xb3   : > { %v502_v5 = vpop.permute.xlu1 %501 }
  0xb4   : > { %v537_v22 = vmul.f32 %v508_v37, %v502_v5  ;;  %v539_v23 = vmul.f32 %v516_v38, %v502_v5  ;;  %v538_v27 = vmul.f32 %v512_v40, %v502_v5  ;;  %v540_v28 = vmul.f32 %v520_v41, %v502_v5 }
  0xf4   : > { %v785_v49 = vpop.f32.mrf.mxu0  ;;  %v838_v50 = vpop.f32.mrf.mxu1 }
  0xf5   : > { %v786_v24 = vadd.f32 %v785_v49, %v525_v43  ;;  %v839_v53 = vadd.f32 %v838_v50, %v527_v44 }
  0xf6   : > { %v787_v55 = vpop.f32.mrf.mxu0  ;;  %v840_v56 = vpop.f32.mrf.mxu1 }
  0xf7   : > { %v788_v57 = vadd.f32 %v787_v55, %v526_v46  ;;  %v841_v59 = vadd.f32 %v840_v56, %v528_v47  ;;  %v879_v8 = vadd.f32 %v2514_v52, %v786_v24  ;;  %v881_v9 = vadd.f32 %v2516_v54, %v839_v53 }
  0xf8   : > { %v789_v62 = vpop.f32.mrf.mxu0  ;;  %v842_v0 = vpop.f32.mrf.mxu1 }
  0xf9   : > { %v790_v10 = vadd.f32 %v789_v62, %v529_v61  ;;  %v843_v11 = vadd.f32 %v842_v0, %v531_v63  ;;  %v880_v14 = vadd.f32 %v2519_v58, %v788_v57  ;;  %v882_v15 = vadd.f32 %v2521_v60, %v841_v59  ;;  %v2050_v59 = vld [vmem:[%s2612_s8 + $0x38] sm:$0xff]  }
  0xfa   : > { %v791_v12 = vpop.f32.mrf.mxu0  ;;  %v844_v13 = vpop.f32.mrf.mxu1  ;;  %v895_v29 = vmax.f32 %v879_v8, 0.0  ;;  %v897_v31 = vmax.f32 %v881_v9, 0.0  ;;  %v2052_v8 = vld [vmem:[%s2612_s8 + $0x30] sm:$0xff]  }
  0xfb   : > { %v792_v16 = vadd.f32 %v791_v12, %v530_v3  ;;  %v845_v17 = vadd.f32 %v844_v13, %v532_v4  ;;  %v883_v18 = vadd.f32 %v2514_v52, %v790_v10  ;;  %v885_v19 = vadd.f32 %v2516_v54, %v843_v11 }
  0xfc   : > { %v795_v20 = vpop.f32.mrf.mxu0  ;;  %v848_v21 = vpop.f32.mrf.mxu1  ;;  %v896_v36 = vmax.f32 %v880_v14, 0.0  ;;  %v898_v39 = vmax.f32 %v882_v15, 0.0  ;;  %v2054_v14 = vld [vmem:[%s2612_s8 + $0x28] sm:$0xff]  }
  0xfd   : > { %v884_v25 = vadd.f32 %v2519_v58, %v792_v16  ;;  %v886_v26 = vadd.f32 %v2521_v60, %v845_v17  ;;  %v899_v32 = vmax.f32 %v883_v18, 0.0  ;;  %v901_v33 = vmax.f32 %v885_v19, 0.0  ;;  %v2055_v17 = vld [vmem:[%s2612_s8 + $0x60] sm:$0xff]   ;;  %v2057_v19 = vld [vmem:[%s2612_s8 + $0x58] sm:$0xff]  }
  0xfe   : > { %v797_v34 = vpop.f32.mrf.mxu0  ;;  %v850_v35 = vpop.f32.mrf.mxu1  ;;  %v796_v45 = vadd.f32 %v795_v20, %v533_v1  ;;  %v849_v46 = vadd.f32 %v848_v21, %v535_v2  ;;  %v2051_v1 = vld [vmem:[%s2612_s8 + $0x70] sm:$0xff]   ;;  %v2056_v18 = vld [vmem:[%s2612_s8 + $0x20] sm:$0xff]   ;;  %v2058_v20 = vld [vmem:[%s2612_s8 + $0x18] sm:$0xff]  }
  0xff   : > { %v900_v43 = vmax.f32 %v884_v25, 0.0  ;;  %v902_v44 = vmax.f32 %v886_v26, 0.0  ;;  %v798_v37 = vadd.f32 %v797_v34, %v534_v6  ;;  %v851_v38 = vadd.f32 %v850_v35, %v536_v7  ;;  %v2059_v21 = vld [vmem:[%s2612_s8 + $0x50] sm:$0xff]   ;;  %v2062_v25 = vld [vmem:[%s2612_s8 + $0x8] sm:$0xff]   ;;  %v2063_v26 = vld [vmem:[%s2612_s8 + $0x40] sm:$0xff]  }
 0x100   : > { %v799_v47 = vpop.f32.mrf.mxu0  ;;  %v852_v48 = vpop.f32.mrf.mxu1  ;;  %v911_v49 = vpack.c.bf16 %v899_v32, %v895_v29  ;;  %v913_v50 = vpack.c.bf16 %v901_v33, %v897_v31  ;;  %v887_v2 = vadd.f32 %v2514_v52, %v796_v45  ;;  %v889_v3 = vadd.f32 %v2516_v54, %v849_v46 }
 0x101   : > { %v800_v40 = vadd.f32 %v799_v47, %v537_v22  ;;  %v853_v41 = vadd.f32 %v852_v48, %v539_v23  ;;  %v888_v51 = vadd.f32 %v2519_v58, %v798_v37  ;;  %v890_v24 = vadd.f32 %v2521_v60, %v851_v38  ;;  %v2060_v22 = vld [vmem:[%s2612_s8 + $0x10] sm:$0xff]   ;;  %v2061_v23 = vld [vmem:[%s2612_s8 + $0x48] sm:$0xff]  }
 0x102   : > { %v801_v53 = vpop.f32.mrf.mxu0  ;;  %v854_v55 = vpop.f32.mrf.mxu1  ;;  %v912_v56 = vpack.c.bf16 %v900_v43, %v896_v36  ;;  %v914_v57 = vpack.c.bf16 %v902_v44, %v898_v39 }
 0x103   : > { %v891_v61 = vadd.f32 %v2514_v52, %v800_v40  ;;  %v893_v62 = vadd.f32 %v2516_v54, %v853_v41  ;;  %v802_v63 = vadd.f32 %v801_v53, %v538_v27  ;;  %v855_v0 = vadd.f32 %v854_v55, %v540_v28  ;;  %v2053_v54 = vld [vmem:[%s2612_s8 + $0x68] sm:$0xff]   ;;  %v2064_v27 = vld [vmem:[%s2612_s8] sm:$0xff]  }
 0x104   : > { %1347 = vmatprep.mubr.bf16.mxu0 %v912_v56  ;;  %1400 = vmatprep.mubr.bf16.mxu1 %v914_v57  ;;  %v904_v6 = vmax.f32 %v888_v51, 0.0  ;;  %v906_v7 = vmax.f32 %v890_v24, 0.0  ;;  %v983_v28 = vld [vmem:[%s2611_s7] sm:$0x3] }
 0x105   : > { %v892_v4 = vadd.f32 %v2519_v58, %v802_v63  ;;  %v894_v5 = vadd.f32 %v2521_v60, %v855_v0  ;;  %1348 = vmatmul.mubr.bf16.vlgmr.msra.gmra.mxu0 %v911_v49  ;;  %1401 = vmatmul.mubr.bf16.vlgmr.msra.gmra.mxu1 %v913_v50  ;;  %v907_v9 = vmax.f32 %v891_v61, 0.0  ;;  %v909_v52 = vmax.f32 %v893_v62, 0.0 }
 0x106   : > { %1841 = vmatpush3.bf16.msra.mxu0 %v2050_v59  ;;  %1876 = vmatpush3.bf16.msra.mxu1 %v2050_v59  ;;  %v903_v58 = vmax.f32 %v887_v2, 0.0  ;;  %v905_v60 = vmax.f32 %v889_v3, 0.0  ;;  %v992_v29 = vrot.slane %v983_v28, %v2237_v30  ;;  %v988_v31 = vrot.slane %v983_v28, %v2273_v42 }
 0x107   : > { %v908_v10 = vmax.f32 %v892_v4, 0.0  ;;  %v910_v11 = vmax.f32 %v894_v5, 0.0  ;;  %1842 = vmatprep.subr.bf16.mxu0 %v2051_v1  ;;  %1869 = vmatprep.subr.bf16.mxu1 %v2051_v1 }
 0x108   : > { %v915_v15 = vpack.c.bf16 %v907_v9, %v903_v58  ;;  %v917_v16 = vpack.c.bf16 %v909_v52, %v905_v60  ;;  %v1820_v60 = vld [vmem:[%s2613_s9] ss:$0 sm:$0xff] }
 0x109   : > { %v916_v12 = vpack.c.bf16 %v908_v10, %v904_v6  ;;  %v918_v13 = vpack.c.bf16 %v910_v11, %v906_v7 }
 0x10a   : > { %1843 = vmatpush3.bf16.msra.mxu0 %v2052_v8  ;;  %1877 = vmatpush3.bf16.msra.mxu1 %v2052_v8 }
 0x10b   : > { %1357 = vmatprep.mubr.bf16.mxu0 %v916_v12  ;;  %1410 = vmatprep.mubr.bf16.mxu1 %v918_v13 }
 0x10c   : > { %1844 = vmatprep.subr.bf16.mxu0 %v2053_v54  ;;  %1870 = vmatprep.subr.bf16.mxu1 %v2053_v54 }
 0x10d   : > { %1358 = vmatmul.mubr.bf16.gmra.mxu0 %v915_v15  ;;  %1411 = vmatmul.mubr.bf16.gmra.mxu1 %v917_v16 }
 0x10e   : > { %1845 = vmatpush3.bf16.msra.mxu0 %v2054_v14  ;;  %1878 = vmatpush3.bf16.msra.mxu1 %v2054_v14 }
 0x10f   : > { %1846 = vmatprep.subr.bf16.mxu0 %v2055_v17  ;;  %1871 = vmatprep.subr.bf16.mxu1 %v2055_v17 }
 0x112   : > { %1847 = vmatpush3.bf16.msra.mxu0 %v2056_v18  ;;  %1879 = vmatpush3.bf16.msra.mxu1 %v2056_v18 }
 0x113   : > { %1848 = vmatprep.subr.bf16.mxu0 %v2057_v19  ;;  %1872 = vmatprep.subr.bf16.mxu1 %v2057_v19 }
 0x116   : > { %1849 = vmatpush3.bf16.msra.mxu0 %v2058_v20  ;;  %1880 = vmatpush3.bf16.msra.mxu1 %v2058_v20 }
 0x117   : > { %1850 = vmatprep.subr.bf16.mxu0 %v2059_v21  ;;  %1873 = vmatprep.subr.bf16.mxu1 %v2059_v21 }
 0x11a   : > { %1851 = vmatpush3.bf16.msra.mxu0 %v2060_v22  ;;  %1881 = vmatpush3.bf16.msra.mxu1 %v2060_v22 }
 0x11b   : > { %1852 = vmatprep.subr.bf16.mxu0 %v2061_v23  ;;  %1874 = vmatprep.subr.bf16.mxu1 %v2061_v23 }
 0x11e   : > { %1853 = vmatpush3.bf16.msra.mxu0 %v2062_v25  ;;  %1882 = vmatpush3.bf16.msra.mxu1 %v2062_v25 }
 0x11f   : > { %1854 = vmatprep.subr.bf16.mxu0 %v2063_v26  ;;  %1875 = vmatprep.subr.bf16.mxu1 %v2063_v26 }
 0x122   : > { %1855 = vmatpush3.bf16.msra.mxu0 %v2064_v27  ;;  %1883 = vmatpush3.bf16.msra.mxu1 %v2064_v27 }
 0x1c5   : > { %v1349_v32 = vpop.f32.mrf.mxu0  ;;  %v1402_v33 = vpop.f32.mrf.mxu1 }
 0x1c6   : > { %v1350_v39 = vadd.f32 %v1349_v32, %v988_v31 }
 0x1c7   : > { %v1351_v34 = vpop.f32.mrf.mxu0  ;;  %v1404_v35 = vpop.f32.mrf.mxu1 }
 0x1c8   : > { %v1352_v36 = vadd.f32 %v1351_v34, %v992_v29  ;;  %v1403_v49 = vadd.f32 %v1402_v33, %v1350_v39 }
 0x1c9   : > { %v1353_v43 = vpop.f32.mrf.mxu0  ;;  %v1406_v44 = vpop.f32.mrf.mxu1 }
 0x1ca   : > { %v1354_v45 = vadd.f32 %v1353_v43, %v988_v31  ;;  %v1405_v38 = vadd.f32 %v1404_v35, %v1352_v36  ;;  %v1421_v56 = vmax.f32 %v1403_v49, 0.0 }
 0x1cb   : > { %v1355_v46 = vpop.f32.mrf.mxu0  ;;  %v1408_v37 = vpop.f32.mrf.mxu1 }
 0x1cc   : > { %v1407_v47 = vadd.f32 %v1406_v44, %v1354_v45  ;;  %v1356_v48 = vadd.f32 %v1355_v46, %v992_v29  ;;  %v1422_v24 = vmax.f32 %v1405_v38, 0.0 }
 0x1cd   : > { %v1359_v50 = vpop.f32.mrf.mxu0  ;;  %v1412_v40 = vpop.f32.mrf.mxu1 }
 0x1ce   : > { %v1409_v30 = vadd.f32 %v1408_v37, %v1356_v48  ;;  %v1423_v41 = vmax.f32 %v1407_v47, 0.0  ;;  %v1360_v57 = vadd.f32 %v1359_v50, %v988_v31 }
 0x1cf   : > { %v1361_v42 = vpop.f32.mrf.mxu0  ;;  %v1414_v51 = vpop.f32.mrf.mxu1 }
 0x1d0   : > { %v1424_v53 = vmax.f32 %v1409_v30, 0.0  ;;  %v1362_v55 = vadd.f32 %v1361_v42, %v992_v29  ;;  %v1429_v0 = vpack.c.bf16 %v1423_v41, %v1421_v56  ;;  %v1413_v5 = vadd.f32 %v1412_v40, %v1360_v57 }
 0x1d1   : > { %v1363_v59 = vpop.f32.mrf.mxu0  ;;  %v1416_v61 = vpop.f32.mrf.mxu1 }
 0x1d2   : > { %v1430_v62 = vpack.c.bf16 %v1424_v53, %v1422_v24  ;;  %v1364_v63 = vadd.f32 %v1363_v59, %v988_v31  ;;  %v1415_v2 = vadd.f32 %v1414_v51, %v1362_v55  ;;  %v1425_v10 = vmax.f32 %v1413_v5, 0.0 }
 0x1d3   : > { %v1365_v1 = vpop.f32.mrf.mxu0  ;;  %v1418_v6 = vpop.f32.mrf.mxu1 }
 0x1d4   : > { %v1417_v3 = vadd.f32 %v1416_v61, %v1364_v63  ;;  %v1366_v4 = vadd.f32 %v1365_v1, %v992_v29  ;;  %1600 = vmatprep.mubr.bf16.mxu0 %v1430_v62  ;;  %v1426_v9 = vmax.f32 %v1415_v2, 0.0 }
 0x1d5   : > { %1601 = vmatmul.mubr.bf16.vlgmr.msra.gmra.mxu0 %v1429_v0 }
 0x1d6   : > { %v1419_v7 = vadd.f32 %v1418_v6, %v1366_v4  ;;  %v1427_v8 = vmax.f32 %v1417_v3, 0.0 }
 0x1d8   : > { %v1428_v52 = vmax.f32 %v1419_v7, 0.0  ;;  %v1431_v54 = vpack.c.bf16 %v1427_v8, %v1425_v10 }
 0x1da   : > { %v1432_v11 = vpack.c.bf16 %v1428_v52, %v1426_v9 }
 0x1dc   : > { %1608 = vmatprep.mubr.bf16.mxu1 %v1432_v11 }
 0x1dd   : > { %1609 = vmatmul.mubr.bf16.vlgmr.msra.gmra.mxu1 %v1431_v54 }
 0x295   : > { %v1856_v58 = vpop.f32.mrf.mxu0 }
 0x297   : > { %v1857_v12 = vpop.f32.mrf.mxu0 }
 0x298   : > { %v1858_v13 = vadd.f32 %v1857_v12, %v1856_v58 }
 0x299   : > { %v1859_v14 = vpop.f32.mrf.mxu0 }
 0x29a   : > { %v1603_v15 = vadd.f32 %v1858_v13, %v1820_v60 }
 0x29b   : > { %v1860_v16 = vpop.f32.mrf.mxu0 }
 0x29c   : > { %1618 = vst.msk [vmem:[%s386_s14] sm:$0xff] %vm1617_vm2, %v1603_v15  ;;  %v1861_v17 = vadd.f32 %v1860_v16, %v1859_v14 }
 0x29d   : > { %v1862_v18 = vpop.f32.mrf.mxu1 }
 0x29e   : > { %v1606_v19 = vadd.f32 %v1861_v17, %v1820_v60 }
 0x29f   : > { %v1863_v20 = vpop.f32.mrf.mxu1 }
 0x2a0   : > { %1619 = vst.msk [vmem:[%s386_s14 + $0x8] sm:$0xff] %vm1617_vm2, %v1606_v19  ;;  %v1864_v21 = vadd.f32 %v1863_v20, %v1862_v18 }
 0x2a1   : > { %v1865_v22 = vpop.f32.mrf.mxu1 }
 0x2a2   : > { %v1611_v23 = vadd.f32 %v1864_v21, %v1820_v60 }
 0x2a3   : > { %v1866_v25 = vpop.f32.mrf.mxu1 }
 0x2a4   : > { %1620 = vst.msk [vmem:[%s386_s14 + $0x10] sm:$0xff] %vm1617_vm2, %v1611_v23  ;;  %v1867_v26 = vadd.f32 %v1866_v25, %v1865_v22 }
 0x2a6   : > { %v1614_v27 = vadd.f32 %v1867_v26, %v1820_v60 }
 0x2a8   : > { %1621 = vst.msk [vmem:[%s386_s14 + $0x18] sm:$0xff] %vm1617_vm2, %v1614_v27 }
 0x2a9 PF: > { %s20_s13 = sadd.s32 1, %s2079_s13  }
 0x2aa   : > { %p17_p4 = scmp.ge.s32.totalorder %s20_s13, 4  }
 0x2ac   :  { %19 = sbr.rel (!%p17_p4) target bundleno = 1 (0x1), region = 93 }

</bundles_post_ra>
